<compile_context>
chip_gen: v5e
topology: v5e:2x2
jax: 0.10.0
libtpu: 0.0.40
codegen_flags: <defaults>
</compile_context>

<pallas_src>
import jax
import jax.numpy as jnp
from jax.experimental import pallas as pl
from jax.experimental.pallas import tpu as pltpu

NEGATIVE_SLOPE = 0.0


def _make_convT_leaky_kernel(N, Cin, Cout, negative_slope):
    def kernel(x_ref, w_ref, b_ref, o_ref):
        # x_ref: (N, Cin, HW)  in VMEM, pixels on lanes (already cropped)
        # w_ref: (Cin, Cout)   in SMEM (torch layout, scalar reads)
        # b_ref: (Cout,)       in SMEM
        # o_ref: (N, Cout, HW) in VMEM — this IS the final tensor (pre-reshape)
        for n in range(N):
            # Load each input channel once as a (1, HW) row.
            xs = [x_ref[n, ic:ic + 1, :] for ic in range(Cin)]
            for oc in range(Cout):
                # Scalar-splat FMAs on the VPU: y = sum_ic w[ic,oc]*x[ic] + b[oc]
                y = xs[0] * w_ref[0, oc] + b_ref[oc]
                for ic in range(1, Cin):
                    y = y + xs[ic] * w_ref[ic, oc]
                if negative_slope == 0.0:
                    y = jnp.maximum(y, 0.0)
                elif 0.0 < negative_slope <= 1.0:
                    y = jnp.maximum(y, y * negative_slope)
                else:
                    y = jnp.where(y > 0, y, y * negative_slope)
                o_ref[n, oc:oc + 1, :] = y.astype(o_ref.dtype)
    return kernel


def conv_transpose_leaky(x_nchw, weight, bias, *, padding=2,
                         negative_slope=NEGATIVE_SLOPE):
    """x_nchw: (N, Cin, H, W); weight: (Cin, Cout) or torch (Cin, Cout, 1, 1);
    bias: (Cout,).  Returns (N, Cout, H - 2*padding, W - 2*padding)."""
    N, Cin, H, W = x_nchw.shape
    if weight.ndim == 4:                       # torch ConvTranspose2d layout
        assert weight.shape[2:] == (1, 1), weight.shape
        weight = weight.reshape(weight.shape[0], weight.shape[1])
    assert weight.shape[0] == Cin, (weight.shape, Cin)
    Cout = weight.shape[1]
    assert bias.shape == (Cout,), bias.shape

    Ho, Wo = H - 2 * padding, W - 2 * padding
    HW = Ho * Wo

    # Crop on the input side (only Cin channels copied), then flatten pixels
    # onto lanes. The kernel then writes the final tensor directly.
    if padding:
        x_crop = x_nchw[:, :, padding:H - padding, padding:W - padding]
    else:
        x_crop = x_nchw
    x_flat = x_crop.reshape(N, Cin, HW)

    kernel = _make_convT_leaky_kernel(N, Cin, Cout, float(negative_slope))

    itemsize = jnp.dtype(x_nchw.dtype).itemsize
    cost = pl.CostEstimate(
        flops=2 * N * Cout * Cin * HW,
        transcendentals=0,
        bytes_accessed=(N * Cin * HW + N * Cout * HW) * itemsize
                        + (Cin * Cout + Cout) * 4,
    )

    out_flat = pl.pallas_call(
        kernel,
        out_shape=jax.ShapeDtypeStruct((N, Cout, HW), x_nchw.dtype),
        in_specs=[
            pl.BlockSpec(memory_space=pltpu.VMEM),   # x
            pl.BlockSpec(memory_space=pltpu.SMEM),   # weight (scalars)
            pl.BlockSpec(memory_space=pltpu.SMEM),   # bias   (scalars)
        ],
        out_specs=pl.BlockSpec(memory_space=pltpu.VMEM),
        cost_estimate=cost,
    )(x_flat, weight, bias)

    return out_flat.reshape(N, Cout, Ho, Wo)   # free reshape, no slice HLO


if __name__ == "__main__":
    key = jax.random.PRNGKey(0)
    kx, kw, kb = jax.random.split(key, 3)

    # Input shape implied by the module: (1, 2, 32, 32)
    x1 = jax.random.normal(kx, (1, 2, 32, 32), dtype=jnp.float32)

    # ConvTranspose2d(2, 8, 1): deterministic synthetic init in [-k, k],
    # k = 1/sqrt(Cin) (weight kept in torch (Cin, Cout) layout, 1x1 squeezed).
    Cin, Cout = 2, 8
    k = 1.0 / jnp.sqrt(jnp.float32(Cin))
    weight = jax.random.uniform(kw, (Cin, Cout), jnp.float32, -k, k)
    bias = jax.random.uniform(kb, (Cout,), jnp.float32, -k, k)

    out = conv_transpose_leaky(x1, weight, bias, padding=2)
    jax.block_until_ready(out)

    # Reference in plain JAX (same math as the PyTorch module).
    x_crop = x1[:, :, 2:-2, 2:-2]
    ref = jnp.einsum("nchw,co->nohw", x_crop, weight) + bias[None, :, None, None]
    ref = jnp.where(ref > 0, ref, ref * NEGATIVE_SLOPE)

    assert out.shape == (1, 8, 28, 28), out.shape
    assert jnp.allclose(out, ref, atol=1e-5, rtol=1e-5)

    print("KERNEL_OK")
</pallas_src>

<mosaic_0001>
module attributes {stable_mosaic.version = 11 : i64} {
  func.func @kernel(%arg0: memref<1x2x784xf32, #tpu.memory_space<vmem>>, %arg1: memref<2x8xf32, #tpu.memory_space<smem>>, %arg2: memref<8xf32, #tpu.memory_space<smem>>, %arg3: memref<1x8x784xf32, #tpu.memory_space<vmem>>) attributes {dimension_semantics = [], scalar_prefetch = 0 : i64, scratch_operands = 0 : i64, tpu.core_type = #tpu.core_type<tc>} {
    %c0 = arith.constant 0 : index
    %c0_0 = arith.constant 0 : index
    %c0_1 = arith.constant 0 : index
    %0 = vector.load %arg0[%c0, %c0_0, %c0_1] : memref<1x2x784xf32, #tpu.memory_space<vmem>>, vector<1x1x784xf32>
    %1 = vector.shape_cast %0 : vector<1x1x784xf32> to vector<1x784xf32>
    %c0_2 = arith.constant 0 : index
    %c1 = arith.constant 1 : index
    %c0_3 = arith.constant 0 : index
    %2 = vector.load %arg0[%c0_2, %c1, %c0_3] : memref<1x2x784xf32, #tpu.memory_space<vmem>>, vector<1x1x784xf32>
    %3 = vector.shape_cast %2 : vector<1x1x784xf32> to vector<1x784xf32>
    %c0_4 = arith.constant 0 : index
    %c0_5 = arith.constant 0 : index
    %4 = memref.load %arg1[%c0_4, %c0_5] : memref<2x8xf32, #tpu.memory_space<smem>>
    %5 = vector.broadcast %4 : f32 to vector<1x784xf32>
    %6 = arith.mulf %1, %5 : vector<1x784xf32>
    %c0_6 = arith.constant 0 : index
    %7 = memref.load %arg2[%c0_6] : memref<8xf32, #tpu.memory_space<smem>>
    %8 = vector.broadcast %7 : f32 to vector<1x784xf32>
    %9 = arith.addf %6, %8 : vector<1x784xf32>
    %c1_7 = arith.constant 1 : index
    %c0_8 = arith.constant 0 : index
    %10 = memref.load %arg1[%c1_7, %c0_8] : memref<2x8xf32, #tpu.memory_space<smem>>
    %11 = vector.broadcast %10 : f32 to vector<1x784xf32>
    %12 = arith.mulf %3, %11 : vector<1x784xf32>
    %13 = arith.addf %9, %12 : vector<1x784xf32>
    %cst = arith.constant 0.000000e+00 : f32
    %14 = vector.broadcast %cst : f32 to vector<1x784xf32>
    %15 = arith.maximumf %13, %14 : vector<1x784xf32>
    %c0_9 = arith.constant 0 : index
    %c0_10 = arith.constant 0 : index
    %c0_11 = arith.constant 0 : index
    %16 = vector.load %arg3[%c0_9, %c0_10, %c0_11] : memref<1x8x784xf32, #tpu.memory_space<vmem>>, vector<1x1x784xf32>
    %17 = vector.shape_cast %16 : vector<1x1x784xf32> to vector<1x784xf32>
    %18 = vector.shape_cast %15 : vector<1x784xf32> to vector<1x1x784xf32>
    tpu.vector_store %arg3[%c0_9, %c0_10, %c0_11], %18 {strides = array<i32>} : memref<1x8x784xf32, #tpu.memory_space<vmem>>, vector<1x1x784xf32>,
    %c0_12 = arith.constant 0 : index
    %c1_13 = arith.constant 1 : index
    %19 = memref.load %arg1[%c0_12, %c1_13] : memref<2x8xf32, #tpu.memory_space<smem>>
    %20 = vector.broadcast %19 : f32 to vector<1x784xf32>
    %21 = arith.mulf %1, %20 : vector<1x784xf32>
    %c1_14 = arith.constant 1 : index
    %22 = memref.load %arg2[%c1_14] : memref<8xf32, #tpu.memory_space<smem>>
    %23 = vector.broadcast %22 : f32 to vector<1x784xf32>
    %24 = arith.addf %21, %23 : vector<1x784xf32>
    %c1_15 = arith.constant 1 : index
    %c1_16 = arith.constant 1 : index
    %25 = memref.load %arg1[%c1_15, %c1_16] : memref<2x8xf32, #tpu.memory_space<smem>>
    %26 = vector.broadcast %25 : f32 to vector<1x784xf32>
    %27 = arith.mulf %3, %26 : vector<1x784xf32>
    %28 = arith.addf %24, %27 : vector<1x784xf32>
    %cst_17 = arith.constant 0.000000e+00 : f32
    %29 = vector.broadcast %cst_17 : f32 to vector<1x784xf32>
    %30 = arith.maximumf %28, %29 : vector<1x784xf32>
    %c0_18 = arith.constant 0 : index
    %c1_19 = arith.constant 1 : index
    %c0_20 = arith.constant 0 : index
    %31 = vector.load %arg3[%c0_18, %c1_19, %c0_20] : memref<1x8x784xf32, #tpu.memory_space<vmem>>, vector<1x1x784xf32>
    %32 = vector.shape_cast %31 : vector<1x1x784xf32> to vector<1x784xf32>
    %33 = vector.shape_cast %30 : vector<1x784xf32> to vector<1x1x784xf32>
    tpu.vector_store %arg3[%c0_18, %c1_19, %c0_20], %33 {strides = array<i32>} : memref<1x8x784xf32, #tpu.memory_space<vmem>>, vector<1x1x784xf32>,
    %c0_21 = arith.constant 0 : index
    %c2 = arith.constant 2 : index
    %34 = memref.load %arg1[%c0_21, %c2] : memref<2x8xf32, #tpu.memory_space<smem>>
    %35 = vector.broadcast %34 : f32 to vector<1x784xf32>
    %36 = arith.mulf %1, %35 : vector<1x784xf32>
    %c2_22 = arith.constant 2 : index
    %37 = memref.load %arg2[%c2_22] : memref<8xf32, #tpu.memory_space<smem>>
    %38 = vector.broadcast %37 : f32 to vector<1x784xf32>
    %39 = arith.addf %36, %38 : vector<1x784xf32>
    %c1_23 = arith.constant 1 : index
    %c2_24 = arith.constant 2 : index
    %40 = memref.load %arg1[%c1_23, %c2_24] : memref<2x8xf32, #tpu.memory_space<smem>>
    %41 = vector.broadcast %40 : f32 to vector<1x784xf32>
    %42 = arith.mulf %3, %41 : vector<1x784xf32>
    %43 = arith.addf %39, %42 : vector<1x784xf32>
    %cst_25 = arith.constant 0.000000e+00 : f32
    %44 = vector.broadcast %cst_25 : f32 to vector<1x784xf32>
    %45 = arith.maximumf %43, %44 : vector<1x784xf32>
    %c0_26 = arith.constant 0 : index
    %c2_27 = arith.constant 2 : index
    %c0_28 = arith.constant 0 : index
    %46 = vector.load %arg3[%c0_26, %c2_27, %c0_28] : memref<1x8x784xf32, #tpu.memory_space<vmem>>, vector<1x1x784xf32>
    %47 = vector.shape_cast %46 : vector<1x1x784xf32> to vector<1x784xf32>
    %48 = vector.shape_cast %45 : vector<1x784xf32> to vector<1x1x784xf32>
    tpu.vector_store %arg3[%c0_26, %c2_27, %c0_28], %48 {strides = array<i32>} : memref<1x8x784xf32, #tpu.memory_space<vmem>>, vector<1x1x784xf32>,
    %c0_29 = arith.constant 0 : index
    %c3 = arith.constant 3 : index
    %49 = memref.load %arg1[%c0_29, %c3] : memref<2x8xf32, #tpu.memory_space<smem>>
    %50 = vector.broadcast %49 : f32 to vector<1x784xf32>
    %51 = arith.mulf %1, %50 : vector<1x784xf32>
    %c3_30 = arith.constant 3 : index
    %52 = memref.load %arg2[%c3_30] : memref<8xf32, #tpu.memory_space<smem>>
    %53 = vector.broadcast %52 : f32 to vector<1x784xf32>
    %54 = arith.addf %51, %53 : vector<1x784xf32>
    %c1_31 = arith.constant 1 : index
    %c3_32 = arith.constant 3 : index
    %55 = memref.load %arg1[%c1_31, %c3_32] : memref<2x8xf32, #tpu.memory_space<smem>>
    %56 = vector.broadcast %55 : f32 to vector<1x784xf32>
    %57 = arith.mulf %3, %56 : vector<1x784xf32>
    %58 = arith.addf %54, %57 : vector<1x784xf32>
    %cst_33 = arith.constant 0.000000e+00 : f32
    %59 = vector.broadcast %cst_33 : f32 to vector<1x784xf32>
    %60 = arith.maximumf %58, %59 : vector<1x784xf32>
    %c0_34 = arith.constant 0 : index
    %c3_35 = arith.constant 3 : index
    %c0_36 = arith.constant 0 : index
    %61 = vector.load %arg3[%c0_34, %c3_35, %c0_36] : memref<1x8x784xf32, #tpu.memory_space<vmem>>, vector<1x1x784xf32>
    %62 = vector.shape_cast %61 : vector<1x1x784xf32> to vector<1x784xf32>
    %63 = vector.shape_cast %60 : vector<1x784xf32> to vector<1x1x784xf32>
    tpu.vector_store %arg3[%c0_34, %c3_35, %c0_36], %63 {strides = array<i32>} : memref<1x8x784xf32, #tpu.memory_space<vmem>>, vector<1x1x784xf32>,
    %c0_37 = arith.constant 0 : index
    %c4 = arith.constant 4 : index
    %64 = memref.load %arg1[%c0_37, %c4] : memref<2x8xf32, #tpu.memory_space<smem>>
    %65 = vector.broadcast %64 : f32 to vector<1x784xf32>
    %66 = arith.mulf %1, %65 : vector<1x784xf32>
    %c4_38 = arith.constant 4 : index
    %67 = memref.load %arg2[%c4_38] : memref<8xf32, #tpu.memory_space<smem>>
    %68 = vector.broadcast %67 : f32 to vector<1x784xf32>
    %69 = arith.addf %66, %68 : vector<1x784xf32>
    %c1_39 = arith.constant 1 : index
    %c4_40 = arith.constant 4 : index
    %70 = memref.load %arg1[%c1_39, %c4_40] : memref<2x8xf32, #tpu.memory_space<smem>>
    %71 = vector.broadcast %70 : f32 to vector<1x784xf32>
    %72 = arith.mulf %3, %71 : vector<1x784xf32>
    %73 = arith.addf %69, %72 : vector<1x784xf32>
    %cst_41 = arith.constant 0.000000e+00 : f32
    %74 = vector.broadcast %cst_41 : f32 to vector<1x784xf32>
    %75 = arith.maximumf %73, %74 : vector<1x784xf32>
    %c0_42 = arith.constant 0 : index
    %c4_43 = arith.constant 4 : index
    %c0_44 = arith.constant 0 : index
    %76 = vector.load %arg3[%c0_42, %c4_43, %c0_44] : memref<1x8x784xf32, #tpu.memory_space<vmem>>, vector<1x1x784xf32>
    %77 = vector.shape_cast %76 : vector<1x1x784xf32> to vector<1x784xf32>
    %78 = vector.shape_cast %75 : vector<1x784xf32> to vector<1x1x784xf32>
    tpu.vector_store %arg3[%c0_42, %c4_43, %c0_44], %78 {strides = array<i32>} : memref<1x8x784xf32, #tpu.memory_space<vmem>>, vector<1x1x784xf32>,
    %c0_45 = arith.constant 0 : index
    %c5 = arith.constant 5 : index
    %79 = memref.load %arg1[%c0_45, %c5] : memref<2x8xf32, #tpu.memory_space<smem>>
    %80 = vector.broadcast %79 : f32 to vector<1x784xf32>
    %81 = arith.mulf %1, %80 : vector<1x784xf32>
    %c5_46 = arith.constant 5 : index
    %82 = memref.load %arg2[%c5_46] : memref<8xf32, #tpu.memory_space<smem>>
    %83 = vector.broadcast %82 : f32 to vector<1x784xf32>
    %84 = arith.addf %81, %83 : vector<1x784xf32>
    %c1_47 = arith.constant 1 : index
    %c5_48 = arith.constant 5 : index
    %85 = memref.load %arg1[%c1_47, %c5_48] : memref<2x8xf32, #tpu.memory_space<smem>>
    %86 = vector.broadcast %85 : f32 to vector<1x784xf32>
    %87 = arith.mulf %3, %86 : vector<1x784xf32>
    %88 = arith.addf %84, %87 : vector<1x784xf32>
    %cst_49 = arith.constant 0.000000e+00 : f32
    %89 = vector.broadcast %cst_49 : f32 to vector<1x784xf32>
    %90 = arith.maximumf %88, %89 : vector<1x784xf32>
    %c0_50 = arith.constant 0 : index
    %c5_51 = arith.constant 5 : index
    %c0_52 = arith.constant 0 : index
    %91 = vector.load %arg3[%c0_50, %c5_51, %c0_52] : memref<1x8x784xf32, #tpu.memory_space<vmem>>, vector<1x1x784xf32>
    %92 = vector.shape_cast %91 : vector<1x1x784xf32> to vector<1x784xf32>
    %93 = vector.shape_cast %90 : vector<1x784xf32> to vector<1x1x784xf32>
    tpu.vector_store %arg3[%c0_50, %c5_51, %c0_52], %93 {strides = array<i32>} : memref<1x8x784xf32, #tpu.memory_space<vmem>>, vector<1x1x784xf32>,
    %c0_53 = arith.constant 0 : index
    %c6 = arith.constant 6 : index
    %94 = memref.load %arg1[%c0_53, %c6] : memref<2x8xf32, #tpu.memory_space<smem>>
    %95 = vector.broadcast %94 : f32 to vector<1x784xf32>
    %96 = arith.mulf %1, %95 : vector<1x784xf32>
    %c6_54 = arith.constant 6 : index
    %97 = memref.load %arg2[%c6_54] : memref<8xf32, #tpu.memory_space<smem>>
    %98 = vector.broadcast %97 : f32 to vector<1x784xf32>
    %99 = arith.addf %96, %98 : vector<1x784xf32>
    %c1_55 = arith.constant 1 : index
    %c6_56 = arith.constant 6 : index
    %100 = memref.load %arg1[%c1_55, %c6_56] : memref<2x8xf32, #tpu.memory_space<smem>>
    %101 = vector.broadcast %100 : f32 to vector<1x784xf32>
    %102 = arith.mulf %3, %101 : vector<1x784xf32>
    %103 = arith.addf %99, %102 : vector<1x784xf32>
    %cst_57 = arith.constant 0.000000e+00 : f32
    %104 = vector.broadcast %cst_57 : f32 to vector<1x784xf32>
    %105 = arith.maximumf %103, %104 : vector<1x784xf32>
    %c0_58 = arith.constant 0 : index
    %c6_59 = arith.constant 6 : index
    %c0_60 = arith.constant 0 : index
    %106 = vector.load %arg3[%c0_58, %c6_59, %c0_60] : memref<1x8x784xf32, #tpu.memory_space<vmem>>, vector<1x1x784xf32>
    %107 = vector.shape_cast %106 : vector<1x1x784xf32> to vector<1x784xf32>
    %108 = vector.shape_cast %105 : vector<1x784xf32> to vector<1x1x784xf32>
    tpu.vector_store %arg3[%c0_58, %c6_59, %c0_60], %108 {strides = array<i32>} : memref<1x8x784xf32, #tpu.memory_space<vmem>>, vector<1x1x784xf32>,
    %c0_61 = arith.constant 0 : index
    %c7 = arith.constant 7 : index
    %109 = memref.load %arg1[%c0_61, %c7] : memref<2x8xf32, #tpu.memory_space<smem>>
    %110 = vector.broadcast %109 : f32 to vector<1x784xf32>
    %111 = arith.mulf %1, %110 : vector<1x784xf32>
    %c7_62 = arith.constant 7 : index
    %112 = memref.load %arg2[%c7_62] : memref<8xf32, #tpu.memory_space<smem>>
    %113 = vector.broadcast %112 : f32 to vector<1x784xf32>
    %114 = arith.addf %111, %113 : vector<1x784xf32>
    %c1_63 = arith.constant 1 : index
    %c7_64 = arith.constant 7 : index
    %115 = memref.load %arg1[%c1_63, %c7_64] : memref<2x8xf32, #tpu.memory_space<smem>>
    %116 = vector.broadcast %115 : f32 to vector<1x784xf32>
    %117 = arith.mulf %3, %116 : vector<1x784xf32>
    %118 = arith.addf %114, %117 : vector<1x784xf32>
    %cst_65 = arith.constant 0.000000e+00 : f32
    %119 = vector.broadcast %cst_65 : f32 to vector<1x784xf32>
    %120 = arith.maximumf %118, %119 : vector<1x784xf32>
    %c0_66 = arith.constant 0 : index
    %c7_67 = arith.constant 7 : index
    %c0_68 = arith.constant 0 : index
    %121 = vector.load %arg3[%c0_66, %c7_67, %c0_68] : memref<1x8x784xf32, #tpu.memory_space<vmem>>, vector<1x1x784xf32>
    %122 = vector.shape_cast %121 : vector<1x1x784xf32> to vector<1x784xf32>
    %123 = vector.shape_cast %120 : vector<1x784xf32> to vector<1x1x784xf32>
    tpu.vector_store %arg3[%c0_66, %c7_67, %c0_68], %123 {strides = array<i32>} : memref<1x8x784xf32, #tpu.memory_space<vmem>>, vector<1x1x784xf32>,
    return
  }
}

</mosaic_0001>

<bundles_post_ra>
// kernel: tpu_custom_call.1
= control target key start
LH: loop header
LB: loop body
LE: loop exit
PB: predicated region body
PF: predicated region fallthrough
CT: control target
= control target key end

     0   :  { %8 = vsyncpa [#allocation3], 0  ;;  %s395_s0 = inlined_call_operand.hbm [shape: f32[1,2,784], index: 0, kind: input, shape index: {}]   ;;  %s396_s1 = inlined_call_operand.hbm [shape: f32[2,8], index: 1, kind: input, shape index: {}]   ;;  %s397_s2 = inlined_call_operand.vmem [shape: f32[8], index: 2, kind: input, shape index: {}]   ;;  %s398_s3 = inlined_call_operand.hbm [shape: f32[1,8,784], index: 3, kind: output, shape index: {}]  }
   0x1   :  { %9 = vsyncpa [#allocation5], 0 }
   0x2   :  { %10 = vsyncpa [#allocation6], 0 }
   0x3   :  { %11 = vsyncpa [#allocation4], 0  ;;  %s17_s14 = sshll.u32 %s395_s0, 4  ;;  %s297_s15 = smov [#allocation2]   ;;  %s18_s14 = int_to_ptr.hbm [resolvable:$true] %s17_s14 }
   0x4   :  { %s19_s16 = sshll.u32 %s297_s15, 4  ;;  %s28_s19 = sshll.u32 %s396_s1, 4  ;;  %s20_s16 = int_to_ptr.vmem [resolvable:$true] %s19_s16  ;;  %s29_s19 = int_to_ptr.hbm [resolvable:$true] %s28_s19 }
   0x5   :  { %22 = dma.hbm_to_vmem [thread:$0]  %s18_s14, 224, %s20_s16, [#allocation3]  }
   0x6   :  { %s298_s20 = smov [#allocation7]   ;;  %s37_s23 = sshll.u32 %s397_s2, 4  ;;  %s38_s23 = int_to_ptr.vmem [resolvable:$true] %s37_s23 }
   0x7   :  { %31 = dma.hbm_to_smem %s29_s19, 32, %s298_s20, [#allocation5]  }
   0x8   :  { %s299_s24 = smov [#allocation8]  }
   0x9   :  { %40 = dma.vmem_to_smem %s38_s23, 16, %s299_s24, [#allocation6]  }
   0xa   :  { %289 = dma.done.wait [#allocation3], 224  }
   0xb   :  { %290 = vsyncadd [#allocation3], 4294967072 }
   0xc   :  { %291 = dma.done.wait [#allocation5], 32  }
   0xd   :  { %292 = vsyncadd [#allocation5], 4294967264 }
   0xe   :  { %293 = dma.done.wait [#allocation6], 16  }
   0xf   :  { %294 = vsyncadd [#allocation6], 4294967280 }
  0x10   :  { %53 = sfence }
  0x11   :  { %s57_s0 = sld [smem:[#allocation7]]  ;;  %v330_v0 = vld [vmem:[#allocation2] ss:$2 sm:$0x7f]  ;;  %v68_v6 = vlaneseq  ;;  %s300_s19 = smov [#allocation9]  }
  0x12   :  { %s60_s1 = sld [smem:[#allocation8]]  ;;  %v332_v1 = vld [vmem:[#allocation2 + $0x1] ss:$2 sm:$0x7f]  ;;  %s177_s20 = sshll.u32 %s300_s19, 4  ;;  %s178_s20 = int_to_ptr.vmem [resolvable:$true] %s177_s20 }
  0x13   :  { %s191_s25 = sld [smem:[#allocation7 + $0x80]]  ;;  %vm337_vm0 = vcmp.lt.s32.totalorder %v68_v6, 784  ;;  %s179_s23 = sshll.u32 %s398_s3, 4  ;;  %s180_s23 = int_to_ptr.hbm [resolvable:$true] %s179_s23 }
  0x14   :  { %s192_s26 = sld [smem:[#allocation7 + $0x1]] }
  0x15   :  { %s193_s27 = sld [smem:[#allocation8 + $0x1]] }
  0x16   :  { %s194_s28 = sld [smem:[#allocation7 + $0x81]] }
  0x17   :  { %v58_v2 = vstv %s57_s0  ;;  %s195_s2 = sld [smem:[#allocation7 + $0x2]] }
  0x18   :  { %v59_v3 = vmul.f32 %v58_v2, %v330_v0  ;;  %v61_v4 = vstv %s60_s1  ;;  %s196_s29 = sld [smem:[#allocation8 + $0x2]] }
  0x19   :  { %v64_v5 = vstv %s191_s25  ;;  %s197_s30 = sld [smem:[#allocation7 + $0x82]] }
  0x1a   :  { %v62_v7 = vadd.f32 %v61_v4, %v59_v3  ;;  %v65_v8 = vmul.f32 %v64_v5, %v332_v1  ;;  %v75_v9 = vstv %s192_s26  ;;  %s198_s4 = sld [smem:[#allocation7 + $0x3]] }
  0x1b   :  { %v76_v10 = vmul.f32 %v75_v9, %v330_v0  ;;  %v78_v11 = vstv %s193_s27  ;;  %s199_s5 = sld [smem:[#allocation8 + $0x3]] }
  0x1c   :  { %v66_v12 = vadd.f32 %v65_v8, %v62_v7  ;;  %v81_v13 = vstv %s194_s28  ;;  %s200_s6 = sld [smem:[#allocation7 + $0x83]] }
  0x1d   :  { %v79_v15 = vadd.f32 %v78_v11, %v76_v10  ;;  %v82_v16 = vmul.f32 %v81_v13, %v332_v1  ;;  %v89_v17 = vstv %s195_s2  ;;  %s201_s7 = sld [smem:[#allocation7 + $0x4]] }
  0x1e   :  { %v67_v18 = vmax.f32 %v66_v12, 0.0  ;;  %v90_v19 = vmul.f32 %v89_v17, %v330_v0  ;;  %v92_v20 = vstv %s196_s29  ;;  %s343_s8 = sld [smem:[#allocation8 + $0x4]] }
  0x1f   :  { %v83_v21 = vadd.f32 %v82_v16, %v79_v15  ;;  %v95_v22 = vstv %s197_s30  ;;  %s203_s9 = sld [smem:[#allocation7 + $0x84]] }
  0x20   :  { %72 = vst.msk [vmem:[#allocation9] ss:$8 sm:$0xf] %vm337_vm0, %v67_v18  ;;  %v93_v23 = vadd.f32 %v92_v20, %v90_v19  ;;  %v96_v24 = vmul.f32 %v95_v22, %v332_v1  ;;  %v103_v25 = vstv %s198_s4  ;;  %s204_s10 = sld [smem:[#allocation7 + $0x5]] }
  0x21   :  { %73 = vst.msk [vmem:[#allocation9] ss:$8 sm:$0x70] %vm337_vm0, %v67_v18  ;;  %v84_v26 = vmax.f32 %v83_v21, 0.0  ;;  %v104_v27 = vmul.f32 %v103_v25, %v330_v0  ;;  %v106_v28 = vstv %s199_s5  ;;  %s351_s11 = sld [smem:[#allocation8 + $0x5]] }
  0x22   :  { %v97_v29 = vadd.f32 %v96_v24, %v93_v23  ;;  %v109_v30 = vstv %s200_s6  ;;  %s206_s12 = sld [smem:[#allocation7 + $0x85]] }
  0x23   :  { %86 = vst.msk [vmem:[#allocation9 + $0x1] ss:$8 sm:$0xf] %vm337_vm0, %v84_v26  ;;  %v107_v31 = vadd.f32 %v106_v28, %v104_v27  ;;  %v110_v32 = vmul.f32 %v109_v30, %v332_v1  ;;  %v117_v33 = vstv %s201_s7  ;;  %s207_s13 = sld [smem:[#allocation7 + $0x6]] }
  0x24   :  { %87 = vst.msk [vmem:[#allocation9 + $0x1] ss:$8 sm:$0x70] %vm337_vm0, %v84_v26  ;;  %v98_v34 = vmax.f32 %v97_v29, 0.0  ;;  %v118_v35 = vmul.f32 %v117_v33, %v330_v0  ;;  %v120_v36 = vstv %s343_s8  ;;  %s208_s14 = sld [smem:[#allocation8 + $0x6]] }
  0x25   :  { %v111_v37 = vadd.f32 %v110_v32, %v107_v31  ;;  %v123_v38 = vstv %s203_s9  ;;  %s209_s15 = sld [smem:[#allocation7 + $0x86]] }
  0x26   :  { %100 = vst.msk [vmem:[#allocation9 + $0x2] ss:$8 sm:$0xf] %vm337_vm0, %v98_v34  ;;  %v121_v39 = vadd.f32 %v120_v36, %v118_v35  ;;  %v124_v40 = vmul.f32 %v123_v38, %v332_v1  ;;  %v131_v41 = vstv %s204_s10  ;;  %s210_s16 = sld [smem:[#allocation7 + $0x7]] }
  0x27   :  { %101 = vst.msk [vmem:[#allocation9 + $0x2] ss:$8 sm:$0x70] %vm337_vm0, %v98_v34  ;;  %v112_v42 = vmax.f32 %v111_v37, 0.0  ;;  %v132_v43 = vmul.f32 %v131_v41, %v330_v0  ;;  %v134_v44 = vstv %s351_s11  ;;  %s211_s17 = sld [smem:[#allocation8 + $0x7]] }
  0x28   :  { %v125_v45 = vadd.f32 %v124_v40, %v121_v39  ;;  %v137_v46 = vstv %s206_s12  ;;  %s212_s18 = sld [smem:[#allocation7 + $0x87]] }
  0x29   :  { %114 = vst.msk [vmem:[#allocation9 + $0x3] ss:$8 sm:$0xf] %vm337_vm0, %v112_v42  ;;  %v135_v47 = vadd.f32 %v134_v44, %v132_v43  ;;  %v138_v48 = vmul.f32 %v137_v46, %v332_v1  ;;  %v145_v49 = vstv %s207_s13 }
  0x2a   :  { %115 = vst.msk [vmem:[#allocation9 + $0x3] ss:$8 sm:$0x70] %vm337_vm0, %v112_v42  ;;  %v126_v50 = vmax.f32 %v125_v45, 0.0  ;;  %v146_v51 = vmul.f32 %v145_v49, %v330_v0  ;;  %v148_v52 = vstv %s208_s14 }
  0x2b   :  { %v139_v53 = vadd.f32 %v138_v48, %v135_v47  ;;  %v151_v54 = vstv %s209_s15 }
  0x2c   :  { %128 = vst.msk [vmem:[#allocation9 + $0x4] ss:$8 sm:$0xf] %vm337_vm0, %v126_v50  ;;  %v149_v55 = vadd.f32 %v148_v52, %v146_v51  ;;  %v152_v56 = vmul.f32 %v151_v54, %v332_v1  ;;  %v159_v57 = vstv %s210_s16 }
  0x2d   :  { %129 = vst.msk [vmem:[#allocation9 + $0x4] ss:$8 sm:$0x70] %vm337_vm0, %v126_v50  ;;  %v140_v58 = vmax.f32 %v139_v53, 0.0  ;;  %v160_v59 = vmul.f32 %v159_v57, %v330_v0  ;;  %v162_v60 = vstv %s211_s17 }
  0x2e   :  { %v153_v61 = vadd.f32 %v152_v56, %v149_v55  ;;  %v165_v62 = vstv %s212_s18 }
  0x2f   :  { %142 = vst.msk [vmem:[#allocation9 + $0x5] ss:$8 sm:$0xf] %vm337_vm0, %v140_v58  ;;  %v163_v63 = vadd.f32 %v162_v60, %v160_v59  ;;  %v166_v2 = vmul.f32 %v165_v62, %v332_v1 }
  0x30   :  { %143 = vst.msk [vmem:[#allocation9 + $0x5] ss:$8 sm:$0x70] %vm337_vm0, %v140_v58  ;;  %v154_v3 = vmax.f32 %v153_v61, 0.0 }
  0x31   :  { %v167_v4 = vadd.f32 %v166_v2, %v163_v63 }
  0x32   :  { %156 = vst.msk [vmem:[#allocation9 + $0x6] ss:$8 sm:$0xf] %vm337_vm0, %v154_v3 }
  0x33   :  { %157 = vst.msk [vmem:[#allocation9 + $0x6] ss:$8 sm:$0x70] %vm337_vm0, %v154_v3  ;;  %v168_v0 = vmax.f32 %v167_v4, 0.0 }
  0x35   :  { %170 = vst.msk [vmem:[#allocation9 + $0x7] ss:$8 sm:$0xf] %vm337_vm0, %v168_v0 }
  0x36   :  { %171 = vst.msk [vmem:[#allocation9 + $0x7] ss:$8 sm:$0x70] %vm337_vm0, %v168_v0 }
  0x37   :  { %182 = dma.vmem_to_hbm [thread:$0]  %s178_s20, 896, %s180_s23, [#allocation4]  }
  0x38   :  { %295 = dma.done.wait [#allocation4], 896  }
  0x39   :  { %296 = vsyncadd [#allocation4], 4294966400 }
  0x3a   :  { %187 = vsyncpa [#allocation3], 1 }
  0x3b   :  { %188 = vsyncpa [#allocation4], 1 }
  0x3c   :  { %189 = vsyncpa [#allocation5], 1 }
  0x3d   :  { %190 = vsyncpa [#allocation6], 1 }

</bundles_post_ra>
